<compile_context>
chip_gen: v7x
topology: tpu7x:2x2x1
jax: 0.10.0
libtpu: 0.0.40
codegen_flags: <defaults>
</compile_context>

<pallas_src>
import numpy as np
import jax
import jax.numpy as jnp
from jax.experimental import pallas as pl
from jax.experimental.pallas import tpu as pltpu

# ---------------- small synthetic config (real model: 100 mel, 1024 ch, 10 layers)
MEL        = 128          # in_channels   (real: 100, padded to the 128-lane tile)
OUT_CH     = 2 * MEL      # out_channels  -> [epsilon | variance logits]
MODEL_CH   = 128          # model_channels (real: 1024)
LATENT_CH  = 128          # in_latent_channels (real: 1024)
NUM_LAYERS = 2            # (real: 10)
HALO       = 8            # zero-halo rows (sublane aligned) for the k=3 'same' conv

TACOTRON_MEL_MAX = 2.3143386840820312
TACOTRON_MEL_MIN = -11.512925148010254


# ---------------- in-kernel helpers ------------------------------------------------
def _mmb(x, w, b):
    # bf16 MXU matmul with f32 accumulation + f32 bias
    return jnp.dot(x.astype(w.dtype), w, preferred_element_type=jnp.float32) + b


def _silu(x):
    # exp and approx-reciprocal both go to the EUP slot (VALU stays free)
    return x * pl.reciprocal(1.0 + jnp.exp(-x), approx=True)


def _norm_silu(x, g, s):
    # per-timestep channel normalization (GroupNorm approximated by LayerNorm)
    mean = jnp.mean(x, axis=-1, keepdims=True)
    var = jnp.mean(jnp.square(x - mean), axis=-1, keepdims=True)
    xn = (x - mean) * jax.lax.rsqrt(var + 1e-5)
    xn = xn * g + s
    return _silu(xn)


def _res(shape):
    """Grid-invariant (resident) full-array block."""
    nd = len(shape)
    return pl.BlockSpec(shape, lambda *_, _nd=nd: (0,) * _nd)


# ---------------- fused whole-loop sampler kernel ----------------------------------
def _build_sampler_kernel(n_layers, t_real):
    def kernel(coefs_ref,                                        # SMEM (n_steps, 8)
               x0_ref, tsin_ref, noise_ref, aligned_ref, uncond_ref,
               inw_ref, inb_ref, t1w_ref, t1b_ref, t2w_ref, t2b_ref,
               g1_ref, s1_ref, w1_ref, b1_ref, ew_ref, eb_ref,
               g2_ref, s2_ref, w2_ref, b2_ref,
               og_ref, os_ref, ow_ref, ob_ref,
               o_ref, x_state):
        step = pl.program_id(0)
        T = o_ref.shape[0]                    # padded row count (multiple of 8)
        mel = o_ref.shape[1]

        @pl.when(step == 0)
        def _init():
            x_state[...] = x0_ref[...]        # haloed initial noise

        xp = x_state[...]                     # (T + 2*HALO, mel); halo rows are zero
        x = xp[HALO:HALO + T]                 # (T, mel) current sample

        # ---- timestep-embedding MLP (computed once, shared by cond & uncond) ----
        e = _mmb(tsin_ref[0], t1w_ref[...], t1b_ref[...])
        e = _mmb(_silu(e), t2w_ref[...], t2b_ref[...])
        e_act = _silu(e)                      # (1, C)

        # ---- k=3 'same' conv as ONE im2col matmul (taps lane-concatenated) ----
        x3 = jnp.concatenate([xp[HALO - 1:HALO - 1 + T],
                              xp[HALO:HALO + T],
                              xp[HALO + 1:HALO + 1 + T]], axis=1)   # (T, 3*mel)
        h0 = _mmb(x3, inw_ref[...], inb_ref[...])                   # (T, C)

        # ---- batch conditional + unconditional into one (2T, C) activation ----
        h = jnp.concatenate([h0 + aligned_ref[...],
                             h0 + uncond_ref[...]], axis=0)

        # ---- residual layer stack (weights stay resident in VMEM) ----
        def layer(l, h):
            h1 = _mmb(_norm_silu(h, g1_ref[l], s1_ref[l]), w1_ref[l], b1_ref[l])
            h1 = h1 + _mmb(e_act, ew_ref[l], eb_ref[l])
            h2 = _mmb(_norm_silu(h1, g2_ref[l], s2_ref[l]), w2_ref[l], b2_ref[l])
            return h + h2
        h = jax.lax.fori_loop(0, n_layers, layer, h, unroll=True)

        # ---- output projection (lane-dense, 2*mel = 256 lanes) ----
        out = _mmb(_norm_silu(h, og_ref[...], os_ref[...]),
                   ow_ref[...], ob_ref[...])                        # (2T, 2*mel)

        # ---- fused p_sample epilogue (CFG + posterior mean + learned-range var) ----
        eps_c = out[:T, :mel]
        var_l = out[:T, mel:]
        eps_u = out[T:, :mel]

        cfk = coefs_ref[step, 0]
        eps = (1.0 + cfk) * eps_c - cfk * eps_u                     # CFG, k=2.0
        pred_x0 = jnp.clip(coefs_ref[step, 1] * x - coefs_ref[step, 2] * eps,
                           -1.0, 1.0)
        mean = coefs_ref[step, 3] * pred_x0 + coefs_ref[step, 4] * x
        frac = (var_l + 1.0) * 0.5
        log_var = frac * coefs_ref[step, 5] + (1.0 - frac) * coefs_ref[step, 6]
        x_new = mean + coefs_ref[step, 7] * jnp.exp(0.5 * log_var) * noise_ref[0]

        # keep padded rows at zero so next step's conv sees proper 'same' padding
        rows = jax.lax.broadcasted_iota(jnp.int32, x_new.shape, 0)
        x_new = jnp.where(rows < t_real, x_new, 0.0)

        x_state[pl.ds(HALO, T), :] = x_new                          # aligned store

        @pl.when(step == pl.num_programs(0) - 1)
        def _finalize():
            o_ref[...] = x_new

    return kernel


# ---------------- conditioning / timestep-independent kernels ----------------------
def _build_cond_kernel(n_cond):
    inv_n = 1.0 / float(n_cond)

    def kernel(xp_ref, w3_ref, b3_ref, g_ref, s_ref, w_ref, b_ref, o_ref):
        @pl.when(pl.program_id(0) == 0)
        def _():
            o_ref[...] = jnp.zeros_like(o_ref)
        xp = xp_ref[0]                         # (T_cond + 2, MEL), zero padded
        T = xp.shape[0] - 2
        x3 = jnp.concatenate([xp[0:T], xp[1:T + 1], xp[2:T + 2]], axis=1)
        h = _mmb(x3, w3_ref[...], b3_ref[...])                       # (T, C)
        h = _mmb(_norm_silu(h, g_ref[...], s_ref[...]), w_ref[...], b_ref[...])
        o_ref[...] += jnp.mean(h, axis=0, keepdims=True) * inv_n     # mean over clips

    return kernel


def ti_kernel(lat_ref, cond_ref, lw_ref, lb_ref, pw_ref, pb_ref,
              g_ref, s_ref, w_ref, b_ref, o_ref):
    code = _mmb(lat_ref[...], lw_ref[...], lb_ref[...])
    code = code + _mmb(cond_ref[...], pw_ref[...], pb_ref[...])
    o_ref[...] = _mmb(_norm_silu(code, g_ref[...], s_ref[...]),
                      w_ref[...], b_ref[...])


# ---------------- diffusion schedule (SpacedDiffusion, 6 of 4000 linear betas) -----
def space_timesteps(num_timesteps, section_counts):
    size_per = num_timesteps // len(section_counts)
    extra = num_timesteps % len(section_counts)
    start_idx, all_steps = 0, []
    for i, section_count in enumerate(section_counts):
        size = size_per + (1 if i < extra else 0)
        frac_stride = 1 if section_count <= 1 else (size - 1) / (section_count - 1)
        cur_idx, taken = 0.0, []
        for _ in range(section_count):
            taken.append(start_idx + round(cur_idx))
            cur_idx += frac_stride
        all_steps += taken
        start_idx += size
    return set(all_steps)


def make_schedule():
    n = 4000
    scale = 1000.0 / n
    betas_full = np.linspace(scale * 0.0001, scale * 0.02, n, dtype=np.float64)
    acp_full = np.cumprod(1.0 - betas_full)
    tmap = sorted(space_timesteps(n, [6]))
    new_betas, last = [], 1.0
    for t in tmap:
        new_betas.append(1.0 - acp_full[t] / last)
        last = acp_full[t]
    b = np.array(new_betas)
    a = 1.0 - b
    acp = np.cumprod(a)
    acp_prev = np.append(1.0, acp[:-1])
    post_var = b * (1.0 - acp_prev) / (1.0 - acp)
    return dict(
        timestep_map=tmap,
        sqrt_recip_acp=np.sqrt(1.0 / acp),
        sqrt_recipm1_acp=np.sqrt(1.0 / acp - 1.0),
        post_c1=b * np.sqrt(acp_prev) / (1.0 - acp),
        post_c2=(1.0 - acp_prev) * np.sqrt(a) / (1.0 - acp),
        max_log=np.log(b),
        min_log=np.log(np.append(post_var[1], post_var[1:])),
    )


def timestep_embedding(t, dim):
    half = dim // 2
    freqs = np.exp(-np.log(10000.0) * np.arange(half, dtype=np.float64) / half)
    args = float(t) * freqs
    return np.concatenate([np.cos(args), np.sin(args)]).astype(np.float32)[None, :]


# ---------------- deterministic synthetic parameters -------------------------------
def init_params(key):
    keys = iter(jax.random.split(key, 64))

    def w(shape, scale=0.05):
        return jax.random.normal(next(keys), shape, dtype=jnp.float32) * scale

    zeros = lambda s: jnp.zeros(s, jnp.float32)
    ones = lambda s: jnp.ones(s, jnp.float32)
    L, C = NUM_LAYERS, MODEL_CH

    return {
        # get_conditioning (contextual_embedder, simplified)
        'cond_conv_w': w((3, MEL, C)), 'cond_conv_b': zeros((1, C)),
        'cond_g': ones((1, C)), 'cond_s': zeros((1, C)),
        'cond_w': w((C, 2 * C)), 'cond_b': zeros((1, 2 * C)),
        # timestep_independent (latent_conditioner + cond projection + code converter)
        'lat_w': w((LATENT_CH, C)), 'lat_b': zeros((1, C)),
        'condproj_w': w((2 * C, C)), 'condproj_b': zeros((1, C)),
        'code_g': ones((1, C)), 'code_s': zeros((1, C)),
        'code_w': w((C, C)), 'code_b': zeros((1, C)),
        # per-step diffusion net
        't1_w': w((C, C)), 't1_b': zeros((1, C)),
        't2_w': w((C, C)), 't2_b': zeros((1, C)),
        'in_conv_w': w((3, MEL, C)), 'in_conv_b': zeros((1, C)),
        'uncond_emb': w((1, C)),
        'out_g': ones((1, C)), 'out_s': zeros((1, C)),
        'out_w': w((C, OUT_CH)), 'out_b': zeros((1, OUT_CH)),
        # residual layers, stacked along a leading layer dim
        'g1': ones((L, 1, C)), 's1': zeros((L, 1, C)),
        'w1': w((L, C, C)), 'b1': zeros((L, 1, C)),
        'emb_w': w((L, C, C)), 'emb_b': zeros((L, 1, C)),
        'g2': ones((L, 1, C)), 's2': zeros((L, 1, C)),
        'w2': w((L, C, C)), 'b2': zeros((L, 1, C)),
    }


# ---------------- model pieces ------------------------------------------------------
def get_conditioning(p, diffusion_conds):
    # diffusion_conds: (N_cond, MEL, T_cond)  (PyTorch NCW)
    n, mel, tc = diffusion_conds.shape
    C = MODEL_CH
    bf16 = jnp.bfloat16
    x = jnp.transpose(diffusion_conds, (0, 2, 1))        # (n, T_cond, MEL)
    xp = jnp.pad(x, ((0, 0), (1, 1), (0, 0)))            # zero 'same' padding, once
    return pl.pallas_call(
        _build_cond_kernel(n), grid=(n,),
        in_specs=[pl.BlockSpec((1, tc + 2, mel), lambda j: (j, 0, 0)),
                  _res((3 * mel, C)), _res((1, C)),
                  _res((1, C)), _res((1, C)),
                  _res((C, 2 * C)), _res((1, 2 * C))],
        out_specs=_res((1, 2 * C)),
        out_shape=jax.ShapeDtypeStruct((1, 2 * C), jnp.float32),
        compiler_params=pltpu.CompilerParams(dimension_semantics=("arbitrary",)),
    )(xp,
      p['cond_conv_w'].reshape(3 * mel, C).astype(bf16), p['cond_conv_b'],
      p['cond_g'], p['cond_s'],
      p['cond_w'].astype(bf16), p['cond_b'])


def timestep_independent(p, latents, cond_vec, out_len):
    # latents: (S, LATENT_CH), cond_vec: (1, 2*MODEL_CH)
    S = latents.shape[0]
    C = MODEL_CH
    bf16 = jnp.bfloat16
    code = pl.pallas_call(
        ti_kernel, grid=(1,),
        in_specs=[_res((S, LATENT_CH)), _res((1, 2 * C)),
                  _res((LATENT_CH, C)), _res((1, C)),
                  _res((2 * C, C)), _res((1, C)),
                  _res((1, C)), _res((1, C)),
                  _res((C, C)), _res((1, C))],
        out_specs=_res((S, C)),
        out_shape=jax.ShapeDtypeStruct((S, C), jnp.float32),
    )(latents, cond_vec,
      p['lat_w'].astype(bf16), p['lat_b'],
      p['condproj_w'].astype(bf16), p['condproj_b'],
      p['code_g'], p['code_s'],
      p['code_w'].astype(bf16), p['code_b'])
    idx = (jnp.arange(out_len) * S) // out_len            # F.interpolate(mode='nearest')
    return code[idx]                                       # (out_len, MODEL_CH)


def diffusion_forward(p, sched, diffusion_conds, best_results, best_latents, key):
    C = MODEL_CH
    L = NUM_LAYERS
    bf16 = jnp.bfloat16

    cond_vec = get_conditioning(p, diffusion_conds)        # (1, 2C)

    # stop-token (83) truncation -- host-side, determines static shapes (once per call)
    codes = np.asarray(jax.device_get(best_results))[0]    # (S,)
    latents = best_latents[0]                              # (S, LATENT_CH)
    ctokens = 0
    for k in range(codes.shape[-1]):
        if codes[k] == 83:
            ctokens += 1
        else:
            ctokens = 0
        if ctokens > 8:
            latents = latents[:k]
            break
    S = latents.shape[0]
    out_len = S * 4 * 24000 // 22050
    t_pad = ((out_len + 7) // 8) * 8                       # sublane-aligned row count

    aligned = timestep_independent(p, latents, cond_vec, out_len)   # (out_len, C)
    aligned_p = jnp.pad(aligned, ((0, t_pad - out_len), (0, 0)))    # (t_pad, C)

    # reverse-time per-step tables: grid step s <-> diffusion index i = n-1-s
    n_steps = len(sched['timestep_map'])
    cfk = 2.0   # TODO(synk): ramped conditioning_free_k schedule not reproduced (constant k)
    coef_rows, tsin_rows = [], []
    for s in range(n_steps):
        i = n_steps - 1 - s
        coef_rows.append([cfk,
                          sched['sqrt_recip_acp'][i], sched['sqrt_recipm1_acp'][i],
                          sched['post_c1'][i], sched['post_c2'][i],
                          sched['max_log'][i], sched['min_log'][i],
                          1.0 if i > 0 else 0.0])
        tsin_rows.append(timestep_embedding(sched['timestep_map'][i], C)[0])
    coefs = jnp.asarray(np.asarray(coef_rows, dtype=np.float32))            # (n, 8)
    tsin_tab = jnp.asarray(np.stack(tsin_rows).astype(np.float32))[:, None, :]  # (n,1,C)

    key, k0, kn = jax.random.split(key, 3)
    x0 = jax.random.normal(k0, (out_len, MEL), dtype=jnp.float32)           # noise * 1
    x0p = jnp.pad(x0, ((HALO, t_pad - out_len + HALO), (0, 0)))             # haloed
    noise_tab = jax.random.normal(kn, (n_steps, t_pad, MEL), dtype=jnp.float32)

    kernel = _build_sampler_kernel(L, out_len)
    x = pl.pallas_call(
        kernel,
        grid=(n_steps,),
        in_specs=[
            pl.BlockSpec(memory_space=pltpu.MemorySpace.SMEM),          # coef table
            _res((t_pad + 2 * HALO, MEL)),                              # haloed x0
            pl.BlockSpec((1, 1, C), lambda s: (s, 0, 0)),               # t_sin table
            pl.BlockSpec((1, t_pad, MEL), lambda s: (s, 0, 0)),         # per-step noise
            _res((t_pad, C)),                                           # aligned embeddings
            _res((1, C)),                                               # uncond embedding
            _res((3 * MEL, C)), _res((1, C)),                           # input conv
            _res((C, C)), _res((1, C)), _res((C, C)), _res((1, C)),     # time-emb MLP
            _res((L, 1, C)), _res((L, 1, C)),
            _res((L, C, C)), _res((L, 1, C)),
            _res((L, C, C)), _res((L, 1, C)),
            _res((L, 1, C)), _res((L, 1, C)),
            _res((L, C, C)), _res((L, 1, C)),
            _res((1, C)), _res((1, C)),
            _res((C, OUT_CH)), _res((1, OUT_CH)),
        ],
        out_specs=_res((t_pad, MEL)),
        out_shape=jax.ShapeDtypeStruct((t_pad, MEL), jnp.float32),
        scratch_shapes=[pltpu.VMEM((t_pad + 2 * HALO, MEL), jnp.float32)],
        compiler_params=pltpu.CompilerParams(
            dimension_semantics=("arbitrary",),
            vmem_limit_bytes=32 * 1024 * 1024),
    )(coefs,
      x0p, tsin_tab, noise_tab, aligned_p, p['uncond_emb'],
      p['in_conv_w'].reshape(3 * MEL, C).astype(bf16), p['in_conv_b'],
      p['t1_w'].astype(bf16), p['t1_b'], p['t2_w'].astype(bf16), p['t2_b'],
      p['g1'], p['s1'], p['w1'].astype(bf16), p['b1'],
      p['emb_w'].astype(bf16), p['emb_b'],
      p['g2'], p['s2'], p['w2'].astype(bf16), p['b2'],
      p['out_g'], p['out_s'], p['out_w'].astype(bf16), p['out_b'])

    mel = x[:out_len].T[None]                                   # back to (1, MEL, T)
    mel = (mel + 1.0) / 2.0 * (TACOTRON_MEL_MAX - TACOTRON_MEL_MIN) + TACOTRON_MEL_MIN
    return mel                                                  # (1, MEL, out_len)


# ---------------- main --------------------------------------------------------------
if __name__ == "__main__":
    N_COND, T_COND, S_CODES, NUM_CAND = 2, 24, 16, 2

    root = jax.random.PRNGKey(0)
    k_cond, k_codes, k_lat, k_params, k_noise = jax.random.split(root, 5)

    diffusion_conds = jax.random.normal(k_cond, (N_COND, MEL, T_COND), dtype=jnp.float32)
    best_results = jax.random.randint(k_codes, (NUM_CAND, S_CODES), 0, 8193, dtype=jnp.int32)
    best_results = best_results.at[0, 6:].set(83)   # exercise stop-token truncation path
    best_latents = jax.random.normal(k_lat, (NUM_CAND, S_CODES, LATENT_CH), dtype=jnp.float32)

    params = init_params(k_params)
    sched = make_schedule()

    mel = diffusion_forward(params, sched, diffusion_conds, best_results, best_latents, k_noise)
    mel = jax.block_until_ready(mel)
    assert mel.ndim == 3 and mel.shape[0] == 1 and mel.shape[1] == MEL
    assert bool(jnp.all(jnp.isfinite(mel)))
    print("KERNEL_OK")
</pallas_src>

<mosaic_0001>
module attributes {stable_mosaic.version = 11 : i64} {
  func.func @kernel(%arg0: i32, %arg1: memref<1x26x128xf32, #tpu.memory_space<vmem>>, %arg2: memref<384x128xbf16, #tpu.memory_space<vmem>>, %arg3: memref<1x128xf32, #tpu.memory_space<vmem>>, %arg4: memref<1x128xf32, #tpu.memory_space<vmem>>, %arg5: memref<1x128xf32, #tpu.memory_space<vmem>>, %arg6: memref<128x256xbf16, #tpu.memory_space<vmem>>, %arg7: memref<1x256xf32, #tpu.memory_space<vmem>>, %arg8: memref<1x256xf32, #tpu.memory_space<vmem>>) attributes {dimension_semantics = [#tpu.dimension_semantics<arbitrary>], iteration_bounds = array<i64: 2>, scalar_prefetch = 0 : i64, scratch_operands = 0 : i64, tpu.core_type = #tpu.core_type<tc>, window_params = [{transform_indices = @transform_0, window_bounds = array<i64: 1, 26, 128>}, {pipeline_mode = #tpu.pipeline_mode<synchronous>, transform_indices = @transform_1, window_bounds = array<i64: 384, 128>}, {pipeline_mode = #tpu.pipeline_mode<synchronous>, transform_indices = @transform_2, window_bounds = array<i64: 1, 128>}, {pipeline_mode = #tpu.pipeline_mode<synchronous>, transform_indices = @transform_3, window_bounds = array<i64: 1, 128>}, {pipeline_mode = #tpu.pipeline_mode<synchronous>, transform_indices = @transform_4, window_bounds = array<i64: 1, 128>}, {pipeline_mode = #tpu.pipeline_mode<synchronous>, transform_indices = @transform_5, window_bounds = array<i64: 128, 256>}, {pipeline_mode = #tpu.pipeline_mode<synchronous>, transform_indices = @transform_6, window_bounds = array<i64: 1, 256>}, {pipeline_mode = #tpu.pipeline_mode<synchronous>, transform_indices = @transform_7, window_bounds = array<i64: 1, 256>}]} {
    %c0_i32 = arith.constant 0 : i32
    %0 = arith.cmpi eq, %arg0, %c0_i32 : i32
    %1 = arith.extui %0 : i1 to i32
    %c0_i32_0 = arith.constant 0 : i32
    %2 = arith.cmpi ne, %1, %c0_i32_0 : i32
    scf.if %2 {
      %cst_30 = arith.constant 0.000000e+00 : f32
      %61 = vector.broadcast %cst_30 : f32 to vector<1x256xf32>
      %c0_31 = arith.constant 0 : index
      %c0_32 = arith.constant 0 : index
      %62 = vector.load %arg8[%c0_31, %c0_32] : memref<1x256xf32, #tpu.memory_space<vmem>>, vector<1x256xf32>
      tpu.vector_store %arg8[%c0_31, %c0_32], %61 {strides = array<i32>} : memref<1x256xf32, #tpu.memory_space<vmem>>, vector<1x256xf32>,
    } else {
    }
    %c0 = arith.constant 0 : index
    %c0_1 = arith.constant 0 : index
    %c0_2 = arith.constant 0 : index
    %3 = vector.load %arg1[%c0, %c0_1, %c0_2] : memref<1x26x128xf32, #tpu.memory_space<vmem>>, vector<1x26x128xf32>
    %4 = vector.shape_cast %3 : vector<1x26x128xf32> to vector<26x128xf32>
    %5 = vector.extract_strided_slice %4 {offsets = [0, 0], sizes = [24, 128], strides = [1, 1]} : vector<26x128xf32> to vector<24x128xf32>
    %6 = vector.extract_strided_slice %4 {offsets = [1, 0], sizes = [24, 128], strides = [1, 1]} : vector<26x128xf32> to vector<24x128xf32>
    %7 = vector.extract_strided_slice %4 {offsets = [2, 0], sizes = [24, 128], strides = [1, 1]} : vector<26x128xf32> to vector<24x128xf32>
    %8 = tpu.concatenate %5, %6, %7 in 1 : vector<24x128xf32>, vector<24x128xf32>, vector<24x128xf32> -> vector<24x384xf32>
    %c0_3 = arith.constant 0 : index
    %c0_4 = arith.constant 0 : index
    %9 = vector.load %arg2[%c0_3, %c0_4] : memref<384x128xbf16, #tpu.memory_space<vmem>>, vector<384x128xbf16>
    %c0_5 = arith.constant 0 : index
    %c0_6 = arith.constant 0 : index
    %10 = vector.load %arg3[%c0_5, %c0_6] : memref<1x128xf32, #tpu.memory_space<vmem>>, vector<1x128xf32>
    %11 = arith.truncf %8 : vector<24x384xf32> to vector<24x384xbf16>
    %cst = arith.constant dense<0.000000e+00> : vector<24x128xf32>
    %12 = tpu.matmul %11, %9, %cst {dimension_numbers = #tpu.dot_dimension_numbers<[1], [0], [0], [1], [0, 0, 1, 1], [], []>} : vector<24x384xbf16>, vector<384x128xbf16>, vector<24x128xf32> -> vector<24x128xf32>
    %13 = vector.broadcast %10 : vector<1x128xf32> to vector<24x128xf32>
    %14 = arith.addf %12, %13 : vector<24x128xf32>
    %c0_7 = arith.constant 0 : index
    %c0_8 = arith.constant 0 : index
    %15 = vector.load %arg4[%c0_7, %c0_8] : memref<1x128xf32, #tpu.memory_space<vmem>>, vector<1x128xf32>
    %c0_9 = arith.constant 0 : index
    %c0_10 = arith.constant 0 : index
    %16 = vector.load %arg5[%c0_9, %c0_10] : memref<1x128xf32, #tpu.memory_space<vmem>>, vector<1x128xf32>
    %cst_11 = arith.constant dense<0.000000e+00> : vector<24xf32>
    %17 = vector.multi_reduction <add>, %14, %cst_11 [1] : vector<24x128xf32> to vector<24xf32>
    %18 = vector.shape_cast %17 : vector<24xf32> to vector<24x1xf32>
    %cst_12 = arith.constant 1.280000e+02 : f32
    %19 = vector.broadcast %cst_12 : f32 to vector<24x1xf32>
    %20 = arith.divf %18, %19 : vector<24x1xf32>
    %21 = vector.broadcast %20 : vector<24x1xf32> to vector<24x128xf32>
    %22 = arith.subf %14, %21 : vector<24x128xf32>
    %23 = arith.mulf %22, %22 : vector<24x128xf32>
    %cst_13 = arith.constant dense<0.000000e+00> : vector<24xf32>
    %24 = vector.multi_reduction <add>, %23, %cst_13 [1] : vector<24x128xf32> to vector<24xf32>
    %25 = vector.shape_cast %24 : vector<24xf32> to vector<24x1xf32>
    %cst_14 = arith.constant 1.280000e+02 : f32
    %26 = vector.broadcast %cst_14 : f32 to vector<24x1xf32>
    %27 = arith.divf %25, %26 : vector<24x1xf32>
    %28 = vector.broadcast %20 : vector<24x1xf32> to vector<24x128xf32>
    %29 = arith.subf %14, %28 : vector<24x128xf32>
    %cst_15 = arith.constant 9.99999974E-6 : f32
    %30 = vector.broadcast %cst_15 : f32 to vector<24x1xf32>
    %31 = arith.addf %27, %30 : vector<24x1xf32>
    %32 = math.rsqrt %31 : vector<24x1xf32>
    %33 = vector.broadcast %32 : vector<24x1xf32> to vector<24x128xf32>
    %34 = arith.mulf %29, %33 : vector<24x128xf32>
    %35 = vector.broadcast %15 : vector<1x128xf32> to vector<24x128xf32>
    %36 = arith.mulf %34, %35 : vector<24x128xf32>
    %37 = vector.broadcast %16 : vector<1x128xf32> to vector<24x128xf32>
    %38 = arith.addf %36, %37 : vector<24x128xf32>
    %cst_16 = arith.constant 0.000000e+00 : f32
    %39 = vector.broadcast %cst_16 : f32 to vector<24x128xf32>
    %40 = arith.subf %39, %38 : vector<24x128xf32>
    %41 = math.exp %40 : vector<24x128xf32>
    %cst_17 = arith.constant 1.000000e+00 : f32
    %42 = vector.broadcast %cst_17 : f32 to vector<24x128xf32>
    %43 = arith.addf %42, %41 : vector<24x128xf32>
    %44 = tpu.reciprocal %43 {approx = true} : vector<24x128xf32> -> vector<24x128xf32>
    %45 = arith.mulf %38, %44 : vector<24x128xf32>
    %c0_18 = arith.constant 0 : index
    %c0_19 = arith.constant 0 : index
    %46 = vector.load %arg6[%c0_18, %c0_19] : memref<128x256xbf16, #tpu.memory_space<vmem>>, vector<128x256xbf16>
    %c0_20 = arith.constant 0 : index
    %c0_21 = arith.constant 0 : index
    %47 = vector.load %arg7[%c0_20, %c0_21] : memref<1x256xf32, #tpu.memory_space<vmem>>, vector<1x256xf32>
    %48 = arith.truncf %45 : vector<24x128xf32> to vector<24x128xbf16>
    %cst_22 = arith.constant dense<0.000000e+00> : vector<24x256xf32>
    %49 = tpu.matmul %48, %46, %cst_22 {dimension_numbers = #tpu.dot_dimension_numbers<[1], [0], [0], [1], [0, 0, 1, 1], [], []>} : vector<24x128xbf16>, vector<128x256xbf16>, vector<24x256xf32> -> vector<24x256xf32>
    %50 = vector.broadcast %47 : vector<1x256xf32> to vector<24x256xf32>
    %51 = arith.addf %49, %50 : vector<24x256xf32>
    %c0_23 = arith.constant 0 : index
    %c0_24 = arith.constant 0 : index
    %52 = vector.load %arg8[%c0_23, %c0_24] : memref<1x256xf32, #tpu.memory_space<vmem>>, vector<1x256xf32>
    %cst_25 = arith.constant dense<0.000000e+00> : vector<256xf32>
    %53 = vector.multi_reduction <add>, %51, %cst_25 [0] : vector<24x256xf32> to vector<256xf32>
    %54 = vector.shape_cast %53 : vector<256xf32> to vector<1x256xf32>
    %cst_26 = arith.constant 2.400000e+01 : f32
    %55 = vector.broadcast %cst_26 : f32 to vector<1x256xf32>
    %56 = arith.divf %54, %55 : vector<1x256xf32>
    %cst_27 = arith.constant 5.000000e-01 : f32
    %57 = vector.broadcast %cst_27 : f32 to vector<1x256xf32>
    %58 = arith.mulf %56, %57 : vector<1x256xf32>
    %59 = arith.addf %52, %58 : vector<1x256xf32>
    %c0_28 = arith.constant 0 : index
    %c0_29 = arith.constant 0 : index
    %60 = vector.load %arg8[%c0_28, %c0_29] : memref<1x256xf32, #tpu.memory_space<vmem>>, vector<1x256xf32>
    tpu.vector_store %arg8[%c0_28, %c0_29], %59 {strides = array<i32>} : memref<1x256xf32, #tpu.memory_space<vmem>>, vector<1x256xf32>,
    return
  }
  func.func @transform_0(%arg0: i32) -> (i32, i32, i32) {
    %c0_i32 = arith.constant 0 : i32
    %c0_i32_0 = arith.constant 0 : i32
    %c0_i32_1 = arith.constant 0 : i32
    return %arg0, %c0_i32, %c0_i32_0 : i32, i32, i32
  }
  func.func @transform_1(%arg0: i32) -> (i32, i32) {
    %c0_i32 = arith.constant 0 : i32
    %c0_i32_0 = arith.constant 0 : i32
    %c0_i32_1 = arith.constant 0 : i32
    return %c0_i32, %c0_i32_0 : i32, i32
  }
  func.func @transform_2(%arg0: i32) -> (i32, i32) {
    %c0_i32 = arith.constant 0 : i32
    %c0_i32_0 = arith.constant 0 : i32
    %c0_i32_1 = arith.constant 0 : i32
    return %c0_i32, %c0_i32_0 : i32, i32
  }
  func.func @transform_3(%arg0: i32) -> (i32, i32) {
    %c0_i32 = arith.constant 0 : i32
    %c0_i32_0 = arith.constant 0 : i32
    %c0_i32_1 = arith.constant 0 : i32
    return %c0_i32, %c0_i32_0 : i32, i32
  }
  func.func @transform_4(%arg0: i32) -> (i32, i32) {
    %c0_i32 = arith.constant 0 : i32
    %c0_i32_0 = arith.constant 0 : i32
    %c0_i32_1 = arith.constant 0 : i32
    return %c0_i32, %c0_i32_0 : i32, i32
  }
  func.func @transform_5(%arg0: i32) -> (i32, i32) {
    %c0_i32 = arith.constant 0 : i32
    %c0_i32_0 = arith.constant 0 : i32
    %c0_i32_1 = arith.constant 0 : i32
    return %c0_i32, %c0_i32_0 : i32, i32
  }
  func.func @transform_6(%arg0: i32) -> (i32, i32) {
    %c0_i32 = arith.constant 0 : i32
    %c0_i32_0 = arith.constant 0 : i32
    %c0_i32_1 = arith.constant 0 : i32
    return %c0_i32, %c0_i32_0 : i32, i32
  }
  func.func @transform_7(%arg0: i32) -> (i32, i32) {
    %c0_i32 = arith.constant 0 : i32
    %c0_i32_0 = arith.constant 0 : i32
    %c0_i32_1 = arith.constant 0 : i32
    return %c0_i32, %c0_i32_0 : i32, i32
  }
}

</mosaic_0001>

<bundles_post_ra>
// kernel: tpu_custom_call.1
= control target key start
LH: loop header
LB: loop body
LE: loop exit
PB: predicated region body
PF: predicated region fallthrough
CT: control target
= control target key end

     0   :  { %12 = vsyncpa [#allocation3], 0  ;;  %s1451_s0 = inlined_call_operand.vmem [shape: f32[2,26,128], index: 0, kind: input, shape index: {}]   ;;  %s1452_s1 = inlined_call_operand.hbm [shape: bf16[384,128], index: 1, kind: input, shape index: {}]   ;;  %s1453_s2 = inlined_call_operand.vmem [shape: f32[1,128], index: 2, kind: input, shape index: {}]   ;;  %s1454_s3 = inlined_call_operand.vmem [shape: f32[1,128], index: 3, kind: input, shape index: {}]   ;;  %s1455_s4 = inlined_call_operand.vmem [shape: f32[1,128], index: 4, kind: input, shape index: {}]   ;;  %s1456_s5 = inlined_call_operand.vmem [shape: bf16[128,256], index: 5, kind: input, shape index: {}]   ;;  %s1457_s6 = inlined_call_operand.vmem [shape: f32[1,256], index: 6, kind: input, shape index: {}]   ;;  %s1458_s7 = inlined_call_operand.hbm [shape: f32[1,256], index: 7, kind: output, shape index: {}]  }
   0x1   :  { %13 = vsyncpa [#allocation4], 0  ;;  %s1287_s24 = smov 0  }
   0x2 LB: > { %s1293_s25 = sadd.s32 4294967295, %s1238_s24   ;;  %p959_p0 = scmp.ge.s32.totalorder %s1238_s24, 1  ;;  %s1238_s24 = sphi %s1287_s24, %s19_s24  }
   0x3   : > { %p197_p1 = scmp.lt.s32.totalorder %s1238_s24, 3  ;;  %s1240_s26 = smov [#allocation2]  }
   0x4   : > { %s209_s27 = sshll.u32 %s1240_s26, 4  ;;  %p1459_p4 = scmp.eq.s32.totalorder %s1293_s25, 0  ;;  %s210_s27 = int_to_ptr.vmem [resolvable:$true] %s209_s27 }
   0x5   : > { %p1298_p3 = pnand %p959_p0, %p197_p1  ;;  %s1170_s9 = scalar_lea.hbm %s1452_s1, 3072 }
   0x6   : > { %p1171_p7 = scmp.ne.s32.totalorder %s1452_s1, %s1170_s9  ;;  %p1177_p11 = scmp.lt.u32.totalorder %s1170_s9, %s1452_s1 }
   0x7   : > { %s1461_s28 = scalar_select %p1298_p3, 1, 0 }
   0x8   : > { %p1081_p5 = pneg %p1298_p3 }
   0xa   : > { %p1307_p6 = pnand %p1459_p4, %p1081_p5 }
   0xc   : > { %p1172_p8 = pneg %p1307_p6 }
   0xe   : > { %p1173_p9 = pnand %p1172_p8, %p1171_p7 }
  0x10   : > { %p1174_p10 = pneg %p1173_p9 }
  0x12   : > { %p1179_p12 = pnand %p1177_p11, %p1174_p10 }
  0x14   : > { %1182 = shalt.err (!%p1179_p12)
}
  0x15   : > { %s1183_s14 = scalar_lea.vmem %s210_s27, 3072  ;;  %p1191_p5 = scmp.lt.s32.totalorder %s210_s27, %s210_s27 }
  0x16   : > { %p1184_p13 = scmp.ne.s32.totalorder %s210_s27, %s1183_s14  ;;  %p1192_p2 = scmp.lt.s32.totalorder %s1183_s14, %s1183_s14 }
  0x18   : > { %p1186_p0 = pnand %p1184_p13, %p1172_p8  ;;  %p1193_p4 = por %p1192_p2, %p1191_p5 }
  0x1a   : > { %p1187_p1 = pneg %p1186_p0 }
  0x1c   : > { %p1194_p3 = pnand %p1193_p4, %p1187_p1 }
  0x1e   : > { %1197 = shalt.err (!%p1194_p3)
}
  0x1f   : > { %s1241_s15 = smov 64   ;;  %s1242_s16 = smov 4  }
  0x20   : > { %1084 = dma.hbm_to_vmem [thread:$0]  (!%p1307_p6), %s1452_s1, 3072, %s210_s27, [#allocation3], %s1241_s15, %s1241_s15, %s1242_s16  }
  0x21   : > { %p1463_p7 = scmp.ne.s32.totalorder %s1461_s28, 0 }
  0x22   : > { %p1464_p9 = scmp.eq.s32.totalorder (!%p1463_p7), %s1293_s25, 0 }
  0x23   : > { %248 = sbr.rel (%p1463_p7) target bundleno = 945 (0x3b1), region = 48 }
  0x2a   : > { %1229 = dma.done.wait (%p1464_p9), [#allocation3], 3072   ;;  %p1465_p8 = pmov %p1464_p9 }
  0x2b   : > { %p275_p2 = scmp.lt.s32.totalorder %s1293_s25, 1  ;;  %p1466_p3 = scmp.ne.s32.totalorder %s1293_s25, 0 }
  0x2c   : > { %1231 = vsyncadd (%p1465_p8), [#allocation3], 4294964224  ;;  %v285_v0 = vlaneseq (!%p1466_p3)  ;;  %v1243_v1 = vmov (!%p1466_p3), 0.0  }
  0x2d   : > { %s276_s19 = scalar_select %p275_p2, %s1293_s25, 1 }
  0x2e   : > { %284 = sbr.rel (%p1466_p3) target bundleno = 53 (0x35), region = 56  ;;  %vm287_vm0 = vcmp.lt.s32.totalorder (!%p1466_p3), %v285_v0, 256 }
  0x2f   : > { %s1014_s20 = sshll.u32 %s276_s19, 5  ;;  %289 = vst.msk [vmem:[#allocation5] sm:$0x3] (!%p1466_p3), %vm287_vm0, %v1243_v1 }
  0x30   : > { %s1338_s23 = scalar_lea.vmem %s1451_s0, %s1014_s20 }
  0x35 PF: > { %v1104_v2 = vld [vmem:[#allocation2 + $0x40] sm:$0xff]   ;;  %v1106_v4 = vld [vmem:[#allocation2 + $0x48] sm:$0xff]   ;;  %v1108_v6 = vld [vmem:[#allocation2 + $0x50] sm:$0xff]   ;;  %vm298_vm1 = vcmask 1046528   ;;  %vm309_vm2 = vcmask 1045504   ;;  %s1246_s22 = smov [#allocation5]  }
  0x36   : > { %v1105_v3 = vld [vmem:[#allocation2] sm:$0xff]   ;;  %1015 = vmatprep.subr.bf16.mxu1 %v1104_v2  ;;  %v1107_v5 = vld [vmem:[#allocation2 + $0x8] sm:$0xff]   ;;  %v1109_v7 = vld [vmem:[#allocation2 + $0x10] sm:$0xff]   ;;  %p1087_p4 = scmp.eq.s32.totalorder %s1293_s25, 1 }
  0x37   : > { %1016 = vmatpush3.bf16.msra.mxu1 %v1105_v3  ;;  %v1110_v8 = vld [vmem:[#allocation2 + $0x58] sm:$0xff]   ;;  %v1112_v10 = vld [vmem:[#allocation2 + $0x60] sm:$0xff]   ;;  %v1114_v12 = vld [vmem:[#allocation2 + $0x68] sm:$0xff]  }
  0x38   : > { %1017 = vmatprep.subr.bf16.mxu1 %v1106_v4  ;;  %v1111_v9 = vld [vmem:[#allocation2 + $0x18] sm:$0xff]   ;;  %v1113_v11 = vld [vmem:[#allocation2 + $0x20] sm:$0xff]   ;;  %v291_v14 = vld [vmem:[%s1338_s23 + $0x8] sm:$0xff] }
  0x39   : > { %v290_v13 = vld [vmem:[%s1338_s23] sm:$0xff]  ;;  %v1345_v15 = vld [vmem:[%s1338_s23 + $0x10] sm:$0xff]  ;;  %v300_v17 = vrot.slane %v291_v14, 1  ;;  %v1115_v19 = vld [vmem:[#allocation2 + $0x28] sm:$0xff]   ;;  %v311_v35 = vrot.slane %v291_v14, 2 }
  0x3a   : > { %v299_v16 = vrot.slane %v290_v13, 1  ;;  %v302_v18 = vrot.slane %v1345_v15, 1  ;;  %v1116_v22 = vld [vmem:[#allocation2 + $0x70] sm:$0xff]   ;;  %v293_v24 = vld [vmem:[%s1338_s23 + $0x18] sm:$0x3]  ;;  %v1120_v29 = vld [vmem:[#allocation2 + $0x80] sm:$0xff]   ;;  %v369_v31 = vpack.c.bf16 %v291_v14, %v290_v13  ;;  %v372_v40 = vpack.c.bf16 %v1345_v15, %v1345_v15 }
  0x3b   : > { %1018 = vmatpush3.bf16.msra.mxu1 %v1107_v5  ;;  %v1117_v25 = vld [vmem:[#allocation2 + $0x30] sm:$0xff]   ;;  %v1118_v26 = vld [vmem:[#allocation2 + $0x78] sm:$0xff]   ;;  %v304_v27 = vrot.slane %v293_v24, 1  ;;  %v1121_v33 = vld [vmem:[#allocation2 + $0x88] sm:$0xff]   ;;  %v310_v34 = vrot.slane %v290_v13, 2  ;;  %v313_v36 = vrot.slane %v1345_v15, 2 }
  0x3c   : > { %1019 = vmatprep.subr.bf16.mxu1 %v1108_v6  ;;  %v301_v20 = vsel %vm298_vm1, %v299_v16, %v300_v17  ;;  %v303_v21 = vsel %vm298_vm1, %v300_v17, %v302_v18  ;;  %v1119_v28 = vld [vmem:[#allocation2 + $0x38] sm:$0xff]   ;;  %v1122_v37 = vld [vmem:[#allocation2 + $0x90] sm:$0xff]   ;;  %v1124_v43 = vld [vmem:[#allocation2 + $0xa0] sm:$0xff]   ;;  %v315_v46 = vrot.slane %v293_v24, 2  ;;  %s907_s23 = sshll.u32 %s1246_s22, 4  ;;  %s908_s23 = int_to_ptr.vmem [resolvable:$true] %s907_s23 }
  0x3d   : > { %v370_v23 = vpack.c.bf16 %v303_v21, %v301_v20  ;;  %v305_v30 = vsel %vm298_vm1, %v302_v18, %v304_v27  ;;  %v312_v38 = vsel %vm309_vm2, %v310_v34, %v311_v35  ;;  %v314_v39 = vsel %vm309_vm2, %v311_v35, %v313_v36  ;;  %v1123_v42 = vld [vmem:[#allocation2 + $0x98] sm:$0xff]   ;;  %v1125_v44 = vld [vmem:[#allocation2 + $0xa8] sm:$0xff]   ;;  %v1126_v45 = vld [vmem:[#allocation2 + $0xb0] sm:$0xff]   ;;  %s1198_s26 = scalar_lea.vmem %s908_s23, 32  ;;  %p1205_p12 = scmp.lt.s32.totalorder %s908_s23, %s908_s23 }
  0x3e   : > { %v373_v32 = vpack.c.bf16 %v305_v30, %v305_v30  ;;  %v371_v41 = vpack.c.bf16 %v314_v39, %v312_v38  ;;  %v1127_v47 = vld [vmem:[#allocation2 + $0xb8] sm:$0xff]   ;;  %v316_v48 = vsel %vm309_vm2, %v313_v36, %v315_v46  ;;  %v967_v61 = vld [vmem:[%s1453_s2] ss:$0 sm:$0xff]  ;;  %v1128_v20 = vld [vmem:[%s1456_s5 + $0x4] ss:$8 sps:$4 sm:$0xff]   ;;  %p1199_p6 = scmp.ne.s32.totalorder %s908_s23, %s1198_s26  ;;  %p1206_p13 = scmp.lt.s32.totalorder %s1198_s26, %s1198_s26 }
  0x3f   : > { %1020 = vmatpush3.bf16.msra.mxu1 %v1109_v7  ;;  %557 = vmatprep.mubr.bf16.mxu1 %v370_v23  ;;  %v374_v49 = vpack.c.bf16 %v316_v48, %v316_v48  ;;  %v1130_v21 = vld [vmem:[%s1456_s5] ss:$8 sps:$4 sm:$0xff]   ;;  %v1133_v23 = vld [vmem:[%s1456_s5 + $0x10] ss:$8 sps:$4 sm:$0xff]   ;;  %v1134_v24 = vld [vmem:[%s1456_s5 + $0x24] ss:$8 sps:$4 sm:$0xff]  }
  0x40   : > { %1021 = vmatprep.subr.bf16.mxu1 %v1110_v8  ;;  %803 = vmatprep.subr.bf16.mxu0 %v1128_v20  ;;  %v1137_v27 = vld [vmem:[%s1456_s5 + $0x34] ss:$8 sps:$4 sm:$0xff]   ;;  %v1142_v30 = vld [vmem:[%s1456_s5 + $0x40] ss:$8 sps:$4 sm:$0xff]   ;;  %v1151_v36 = vld [vmem:[%s1456_s5 + $0x70] ss:$8 sps:$4 sm:$0xff]   ;;  %p1200_p10 = pnand %p1199_p6, %p1087_p4  ;;  %p1207_p0 = por %p1206_p13, %p1205_p12 }
  0x41   : > { %804 = vmatpush1.bf16.msra.mxu0 %v1130_v21  ;;  %v1148_v34 = vld [vmem:[%s1456_s5 + $0x60] ss:$8 sps:$4 sm:$0xff]   ;;  %v1149_v35 = vld [vmem:[%s1456_s5 + $0x74] ss:$8 sps:$4 sm:$0xff]  }
  0x42   : > { %p1201_p11 = pneg %p1200_p10 }
  0x43   : > { %1022 = vmatpush3.bf16.msra.mxu1 %v1111_v9 }
  0x44   : > { %1023 = vmatprep.subr.bf16.mxu1 %v1112_v10  ;;  %p1208_p1 = pnand %p1207_p0, %p1201_p11 }
  0x47   : > { %1024 = vmatpush3.bf16.msra.mxu1 %v1113_v11 }
  0x48   : > { %1025 = vmatprep.subr.bf16.mxu1 %v1114_v12 }
  0x4b   : > { %1026 = vmatpush3.bf16.msra.mxu1 %v1115_v19 }
  0x4c   : > { %1027 = vmatprep.subr.bf16.mxu1 %v1116_v22  ;;  %v1131_v22 = vld [vmem:[%s1456_s5 + $0x14] ss:$8 sps:$4 sm:$0xff]  }
  0x4d   : > { %805 = vmatprep.subr.bf16.mxu0 %v1131_v22 }
  0x4e   : > { %806 = vmatpush1.bf16.msra.mxu0 %v1133_v23 }
  0x4f   : > { %1028 = vmatpush3.bf16.msra.mxu1 %v1117_v25  ;;  %v1244_v25 = vmov 0   ;;  %807 = vmatprep.subr.bf16.mxu0 %v1134_v24 }
  0x50   : > { %1029 = vmatprep.subr.bf16.mxu1 %v1118_v26  ;;  %835 = vmatprep.mubr.bf16.mxu0 %v1244_v25  ;;  %v1136_v26 = vld [vmem:[%s1456_s5 + $0x20] ss:$8 sps:$4 sm:$0xff]  }
  0x52   : > { %808 = vmatpush1.bf16.msra.mxu0 %v1136_v26 }
  0x53   : > { %1030 = vmatpush3.bf16.msra.mxu1 %v1119_v28  ;;  %v1139_v28 = vld [vmem:[%s1456_s5 + $0x30] ss:$8 sps:$4 sm:$0xff]   ;;  %809 = vmatprep.subr.bf16.mxu0 %v1137_v27 }
  0x54   : > { %1053 = vmatprep.subr.bf16.mxu1 %v1120_v29 }
  0x56   : > { %558 = vmatmul.mubr.bf16.vlgmr.msra.gmra.mrb[0].mxu1 %v369_v31  ;;  %810 = vmatpush1.bf16.msra.mxu0 %v1139_v28  ;;  %v1143_v31 = vld [vmem:[%s1456_s5 + $0x54] ss:$8 sps:$4 sm:$0xff]  }
  0x57   : > { %1054 = vmatpush3.bf16.msra.mxu1 %v1120_v29  ;;  %565 = vmatprep.mubr.bf16.mxu1 %v373_v32  ;;  %v1140_v29 = vld [vmem:[%s1456_s5 + $0x44] ss:$8 sps:$4 sm:$0xff]   ;;  %v1145_v32 = vld [vmem:[%s1456_s5 + $0x50] ss:$8 sps:$4 sm:$0xff]  }
  0x58   : > { %1055 = vmatprep.subr.bf16.mxu1 %v1121_v33  ;;  %811 = vmatprep.subr.bf16.mxu0 %v1140_v29 }
  0x5a   : > { %812 = vmatpush1.bf16.msra.mxu0 %v1142_v30 }
  0x5b   : > { %1056 = vmatpush3.bf16.msra.mxu1 %v1121_v33  ;;  %813 = vmatprep.subr.bf16.mxu0 %v1143_v31  ;;  %v1146_v33 = vld [vmem:[%s1456_s5 + $0x64] ss:$8 sps:$4 sm:$0xff]  }
  0x5c   : > { %1057 = vmatprep.subr.bf16.mxu1 %v1122_v37 }
  0x5e   : > { %566 = vmatmul.mubr.bf16.gmra.mrb[4].mxu1 %v372_v40  ;;  %814 = vmatpush1.bf16.msra.mxu0 %v1145_v32 }
  0x5f   : > { %1058 = vmatpush3.bf16.msra.mxu1 %v1122_v37  ;;  %1069 = vmatprep.mubr.bf16.mxu1 %v371_v41 }
  0x60   : > { %1059 = vmatprep.subr.bf16.mxu1 %v1123_v42  ;;  %815 = vmatprep.subr.bf16.mxu0 %v1146_v33 }
  0x62   : > { %816 = vmatpush1.bf16.msra.mxu0 %v1148_v34 }
  0x63   : > { %1060 = vmatpush3.bf16.msra.mxu1 %v1123_v42  ;;  %817 = vmatprep.subr.bf16.mxu0 %v1149_v35 }
  0x64   : > { %1061 = vmatprep.subr.bf16.mxu1 %v1124_v43 }
  0x66   : > { %818 = vmatpush1.bf16.msra.mxu0 %v1151_v36 }
  0x67   : > { %1062 = vmatpush3.bf16.msra.mxu1 %v1124_v43 }
  0x68   : > { %1063 = vmatprep.subr.bf16.mxu1 %v1125_v44 }
  0x6b   : > { %1064 = vmatpush3.bf16.msra.mxu1 %v1125_v44 }
  0x6c   : > { %1065 = vmatprep.subr.bf16.mxu1 %v1126_v45 }
  0x6f   : > { %1066 = vmatpush3.bf16.msra.mxu1 %v1126_v45 }
  0x70   : > { %1067 = vmatprep.subr.bf16.mxu1 %v1127_v47 }
  0x73   : > { %1068 = vmatpush3.bf16.msra.mxu1 %v1127_v47  ;;  %v992_v47 = vld [vmem:[%s1454_s3] ss:$0 sm:$0xff] }
  0x76   : > { %1070 = vmatmul.mubr.bf16.vlgmr.msra.gmra.mrb[8].mxu1 %v374_v49  ;;  %v993_v49 = vld [vmem:[%s1455_s4] ss:$0 sm:$0xff] }
 0x129   : > { %v1031_v50 = vpop.f32.mrb[0].mxu1 }
 0x12a   : > { %v1032_v51 = vpop.f32.mrb[1].mxu1 }
 0x12b   : > { %v1033_v52 = vadd.f32 %v1032_v51, %v1031_v50  ;;  %v1034_v53 = vpop.f32.mrb[2].mxu1 }
 0x12c   : > { %v1035_v54 = vpop.f32.mrb[3].mxu1 }
 0x12d   : > { %v1036_v55 = vadd.f32 %v1035_v54, %v1034_v53  ;;  %v560_v0 = vadd.f32 %v1033_v52, %v967_v61 }
 0x12f   : > { %v563_v5 = vadd.f32 %v1036_v55, %v967_v61 }
 0x131   : > { %v1037_v56 = vpop.f32.mrb[4].mxu1 }
 0x132   : > { %v1038_v57 = vpop.f32.mrb[5].mxu1 }
 0x133   : > { %v1039_v58 = vadd.f32 %v1038_v57, %v1037_v56  ;;  %v1040_v59 = vpop.f32.mrb[6].mxu1 }
 0x134   : > { %v1041_v60 = vpop.f32.mrb[7].mxu1 }
 0x135   : > { %v568_v62 = vadd.f32 %v1039_v58, %v967_v61 }
 0x149   : > { %v1071_v63 = vpop.f32.mrb[8].mxu1 }
 0x14a   : > { %v616_v1 = vadd.f32 %v1071_v63, %v568_v62  ;;  %v607_v2 = vpop.f32.mrb[9].mxu1 }
 0x14b   : > { %v608_v3 = vadd.f32 %v607_v2, %v560_v0  ;;  %v1072_v4 = vpop.f32.mrb[10].mxu1 }
 0x14c   : > { %v610_v6 = vpop.f32.mrb[11].mxu1  ;;  %627 = vadd.xlane.f32.xlu1 %v616_v1 }
 0x14d   : > { %v611_v7 = vadd.f32 %v610_v6, %v563_v5  ;;  %623 = vadd.xlane.f32.xlu0 %v608_v3 }
 0x151   : > { %625 = vadd.xlane.f32.xlu0 %v611_v7 }
 0x1d9   : > { %v628_v8 = vpop.xlane.xlu1 %627 }
 0x1da   : > { %v624_v9 = vpop.xlane.xlu0 %623  ;;  %v632_v10 = vmul.f32 0.0078125, %v628_v8 }
 0x1db   : > { %v630_v11 = vmul.f32 0.0078125, %v624_v9 }
 0x1dc   : > { %v1361_v14 = vsub.f32 %v616_v1, %v632_v10 }
 0x1dd   : > { %v633_v12 = vsub.f32 %v608_v3, %v630_v11 }
 0x1de   : > { %v626_v13 = vpop.xlane.xlu0 %625  ;;  %v638_v18 = vmul.f32 %v1361_v14, %v1361_v14 }
 0x1df   : > { %v631_v15 = vmul.f32 0.0078125, %v626_v13  ;;  %v636_v16 = vmul.f32 %v633_v12, %v633_v12 }
 0x1e1   : > { %v634_v17 = vsub.f32 %v611_v7, %v631_v15  ;;  %639 = vadd.xlane.f32.xlu1 %v636_v16  ;;  %v713_v16 = vlaneseq }
 0x1e3   : > { %v637_v19 = vmul.f32 %v634_v17, %v634_v17  ;;  %vm897_vm3 = vcmp.lt.s32.totalorder %v713_v16, 256 }
 0x1e5   : > { %643 = vadd.xlane.f32.xlu1 %v638_v18  ;;  %641 = vadd.xlane.f32.xlu0 %v637_v19  ;;  %v709_v19 = vld [vmem:[%s1457_s6] sm:$0x3] }
 0x26e   : > { %v640_v37 = vpop.xlane.xlu1 %639 }
 0x26f   : > { %v645_v38 = vmul.f32 0.0078125, %v640_v37 }
 0x271   : > { %v648_v39 = vadd.f32 1e-05, %v645_v38 }
 0x272   : > { %v644_v40 = vpop.xlane.xlu1 %643  ;;  %v642_v41 = vpop.xlane.xlu0 %641 }
 0x273   : > { %1152 = vrsqrt.f32 %v648_v39  ;;  %v647_v42 = vmul.f32 0.0078125, %v644_v40  ;;  %v646_v43 = vmul.f32 0.0078125, %v642_v41 }
 0x275   : > { %v650_v44 = vadd.f32 1e-05, %v647_v42  ;;  %v649_v45 = vadd.f32 1e-05, %v646_v43 }
 0x277   : > { %1154 = vrsqrt.f32 %v650_v44 }
 0x278   : > { %1156 = vrsqrt.f32 %v649_v45 }
 0x27d   : > { %v1153_v46 = vpop.eup %1152 }
 0x27e   : > { %v654_v48 = vmul.f32 %v1153_v46, %v633_v12 }
 0x280   : > { %v663_v50 = vmul.f32 %v992_v47, %v654_v48 }
 0x281   : > { %v1155_v51 = vpop.eup %1154 }
 0x282   : > { %v1157_v52 = vpop.eup %1156  ;;  %v672_v53 = vadd.f32 %v993_v49, %v663_v50  ;;  %v656_v54 = vmul.f32 %v1155_v51, %v1361_v14 }
 0x283   : > { %v655_v55 = vmul.f32 %v1157_v52, %v634_v17  ;;  %v714_v17 = vshrl.u32 %v713_v16, 7 }
 0x284   : > { %v675_v56 = vsub.f32 0.0, %v672_v53  ;;  %v665_v57 = vmul.f32 %v992_v47, %v656_v54 }
 0x285   : > { %v664_v58 = vmul.f32 %v992_v47, %v655_v55  ;;  %v715_v18 = vsub.s32 0, %v714_v17  ;;  %v719_v20 = vsub.s32 1, %v714_v17 }
 0x286   : > { %v678_v59 = vmul.f32 1.442695, %v675_v56  ;;  %v674_v60 = vadd.f32 %v993_v49, %v665_v57 }
 0x287   : > { %v673_v61 = vadd.f32 %v993_v49, %v664_v58  ;;  %v716_v21 = vrot.slane %v709_v19, %v715_v18  ;;  %v720_v23 = vrot.slane %v709_v19, %v719_v20  ;;  %v1245_v49 = vmov 1966171168  }
 0x288   : > { %1158 = vpow2.f32 %v678_v59  ;;  %v677_v62 = vsub.f32 0.0, %v674_v60  ;;  %v880_v50 = vunpack.c.l.s4 %v1245_v49 }
 0x289   : > { %v676_v63 = vsub.f32 0.0, %v673_v61 }
 0x28a   : > { %v682_v0 = vmul.f32 1.442695, %v677_v62  ;;  %v881_v55 = vunpack.c.0.s8 %v880_v50 }
 0x28b   : > { %v680_v1 = vmul.f32 1.442695, %v676_v63  ;;  %v854_v63 = vld [vmem:[#allocation5] sm:$0x3] }
 0x28c   : > { %1160 = vpow2.f32 %v682_v0 }
 0x28d   : > { %1162 = vpow2.f32 %v680_v1 }
 0x292   : > { %v1159_v2 = vpop.eup %1158 }
 0x293   : > { %v684_v3 = vadd.f32 1.0, %v1159_v2 }
 0x295   : > { %1164 = vrcp.f32 %v684_v3 }
 0x296   : > { %v1161_v4 = vpop.eup %1160 }
 0x297   : > { %v1163_v5 = vpop.eup %1162  ;;  %v686_v7 = vadd.f32 1.0, %v1161_v4 }
 0x298   : > { %v685_v6 = vadd.f32 1.0, %v1163_v5 }
 0x29a   : > { %1166 = vrcp.f32 %v685_v6 }
 0x29b   : > { %1168 = vrcp.f32 %v686_v7 }
 0x29f   : > { %v1165_v8 = vpop.eup %1164 }
 0x2a0   : > { %v690_v10 = vmul.f32 %v1165_v8, %v672_v53 }
 0x2a4   : > { %v1167_v9 = vpop.eup %1166 }
 0x2a5   : > { %v691_v11 = vmul.f32 %v1167_v9, %v673_v61  ;;  %v1169_v13 = vpop.eup %1168 }
 0x2a6   : > { %v692_v14 = vmul.f32 %v1169_v13, %v674_v60  ;;  %v884_v60 = vsub.s32 %v881_v55, %v714_v17 }
 0x2a7   : > { %v710_v12 = vpack.c.bf16 %v691_v11, %v690_v10 }
 0x2a8   : > { %v711_v15 = vpack.c.bf16 %v692_v14, %v692_v14 }
 0x2a9   : > { %836 = vmatmul.mubr.bf16.vlgmr.msra.gmra.mrb[0].mxu0 %v710_v12 }
 0x2aa   : > { %845 = vmatprep.mubr.bf16.mxu0 %v1244_v25 }
 0x2b1   : > { %846 = vmatmul.mubr.bf16.gmra.mrb[4].mxu0 %v711_v15 }
 0x37c   : > { %v837_v22 = vpop.f32.mrb[0].mxu0 }
 0x37d   : > { %v839_v24 = vpop.f32.mrb[1].mxu0  ;;  %v838_v27 = vadd.f32 %v837_v22, %v716_v21 }
 0x37e   : > { %v841_v26 = vpop.f32.mrb[2].mxu0  ;;  %v840_v25 = vadd.f32 %v839_v24, %v720_v23 }
 0x37f   : > { %v842_v28 = vadd.f32 %v841_v26, %v716_v21  ;;  %v843_v29 = vpop.f32.mrb[3].mxu0 }
 0x380   : > { %v844_v30 = vadd.f32 %v843_v29, %v720_v23 }
 0x381   : > { %v855_v31 = vadd.f32 %v842_v28, %v838_v27 }
 0x382   : > { %v863_v32 = vadd.f32 %v844_v30, %v840_v25 }
 0x384   : > { %v847_v33 = vpop.f32.mrb[4].mxu0 }
 0x385   : > { %v848_v34 = vadd.f32 %v847_v33, %v716_v21  ;;  %v849_v35 = vpop.f32.mrb[5].mxu0 }
 0x386   : > { %v850_v36 = vadd.f32 %v849_v35, %v720_v23  ;;  %v851_v37 = vpop.f32.mrb[6].mxu0 }
 0x387   : > { %v856_v38 = vadd.f32 %v855_v31, %v848_v34  ;;  %v852_v39 = vpop.f32.mrb[7].mxu0 }
 0x388   : > { %v864_v40 = vadd.f32 %v863_v32, %v850_v36 }
 0x389   : > { %v857_v41 = vrot.slane %v856_v38, 4 }
 0x38a   : > { %v865_v42 = vrot.slane %v864_v40, 4 }
 0x38b   : > { %v858_v43 = vadd.f32 %v857_v41, %v856_v38 }
 0x38c   : > { %v866_v44 = vadd.f32 %v865_v42, %v864_v40 }
 0x38d   : > { %v859_v45 = vrot.slane %v858_v43, 2 }
 0x38e   : > { %v867_v46 = vrot.slane %v866_v44, 2 }
 0x38f   : > { %v860_v47 = vadd.f32 %v859_v45, %v858_v43 }
 0x390   : > { %v868_v48 = vadd.f32 %v867_v46, %v866_v44 }
 0x391   : > { %v861_v51 = vrot.slane %v860_v47, 1 }
 0x392   : > { %v869_v52 = vrot.slane %v868_v48, 1 }
 0x393   : > { %v862_v53 = vadd.f32 %v861_v51, %v860_v47 }
 0x394   : > { %v870_v54 = vadd.f32 %v869_v52, %v868_v48 }
 0x395   : > { %v872_v56 = vmul.f32 0.041666668, %v862_v53 }
 0x396   : > { %v873_v57 = vmul.f32 0.041666668, %v870_v54 }
 0x397   : > { %v874_v58 = vmul.f32 0.5, %v872_v56 }
 0x398   : > { %v875_v59 = vmul.f32 0.5, %v873_v57 }
 0x39a   : > { %v878_v61 = vcombine.low %v874_v58, %v875_v59 }
 0x39c   : > { %v885_v62 = vrot.slane %v878_v61, %v884_v60 }
 0x39e   : > { %v892_v0 = vrot.slane %v885_v62, %v884_v60 }
 0x3a0   : > { %v894_v1 = vadd.f32 %v892_v0, %v854_v63 }
 0x3a2   : > { %899 = vst.msk [vmem:[#allocation5] sm:$0x3] %vm897_vm3, %v894_v1 }
 0x3a3   : > { %1211 = shalt.err (!%p1208_p1)
}
 0x3a4   : > { %s1212_s29 = scalar_lea.hbm %s1458_s7, 32 }
 0x3a5   : > { %p1213_p5 = scmp.ne.s32.totalorder %s1458_s7, %s1212_s29  ;;  %p1218_p8 = scmp.lt.u32.totalorder %s1212_s29, %s1458_s7 }
 0x3a7   : > { %p1214_p7 = pnand %p1213_p5, %p1087_p4 }
 0x3a9   : > { %p1215_p9 = pneg %p1214_p7 }
 0x3ab   : > { %p1220_p2 = pnand %p1218_p8, %p1215_p9 }
 0x3ad   : > { %1223 = shalt.err (!%p1220_p2)
}
 0x3ae   : > { %1078 = dma.vmem_to_hbm [thread:$0]  (%p1087_p4), %s908_s23, 32, %s1458_s7, [#allocation4]  }
 0x3af   : > { %1233 = dma.done.wait (%p1087_p4), [#allocation4], 32  }
 0x3b0   : > { %1235 = vsyncadd (%p1087_p4), [#allocation4], 4294967264 }
 0x3b1 PF: > { %s19_s24 = sadd.s32 1, %s1238_s24  }
 0x3b2   : > { %p16_p3 = scmp.ge.s32.totalorder %s19_s24, 4  }
 0x3b4   :  { %18 = sbr.rel (!%p16_p3) target bundleno = 2 (0x2), region = 84 }
 0x3bb   :  { %920 = vsyncpa [#allocation3], 1 }
 0x3bc   :  { %922 = vsyncpa [#allocation3 + $0x1], 1 }
 0x3bd   :  { %923 = vsyncpa [#allocation4], 1 }
 0x3be   :  { %925 = vsyncpa [#allocation4 + $0x1], 1 }

</bundles_post_ra>
